<compile_context>
chip_gen: v7x
topology: tpu7x:2x2x1
jax: 0.10.0
libtpu: 0.0.40
codegen_flags: <defaults>
</compile_context>

<pallas_src>
import math
from functools import partial

import jax
import jax.numpy as jnp
from jax.experimental import pallas as pl
from jax.experimental.pallas import tpu as pltpu

E_LAMBDA = 1e-4


# ----------------------------- kernels ------------------------------------ #

def _simam_rowwise_kernel(x_ref, o_ref, *, hw):
    # x_ref: (tile_rows, HW) -- one (b, c) plane per row.
    x = x_ref[...].astype(jnp.float32)
    s1 = jnp.sum(x, axis=-1, keepdims=True)
    s2 = jnp.sum(x * x, axis=-1, keepdims=True)
    mean = s1 * (1.0 / hw)
    energy = jnp.maximum(s2 - s1 * mean, 0.0)      # sum((x-mean)^2), clamped >= 0
    inv = 1.0 / (energy + E_LAMBDA)                # exact; one per row
    o_ref[...] = (x * ((x - mean) * inv)).astype(o_ref.dtype)


def _simam_packed_kernel(x_ref, sel_ref, selt_ref, o_ref, *, hw):
    # x_ref: (tile_rows, k*HW) -- k planes packed per row so the lane axis is
    # 128-dense.  sel_ref: (k*HW, k) 0/1 segment selector; selt_ref: transpose.
    # Per-plane sums and broadcast-back use the otherwise-idle MXU.
    x = x_ref[...].astype(jnp.float32)
    sel = sel_ref[...]
    sel_t = selt_ref[...]
    s1 = jnp.dot(x, sel, preferred_element_type=jnp.float32)        # (tile, k)
    s2 = jnp.dot(x * x, sel, preferred_element_type=jnp.float32)    # (tile, k)
    mean = s1 * (1.0 / hw)
    energy = jnp.maximum(s2 - s1 * mean, 0.0)
    inv = 1.0 / (energy + E_LAMBDA)
    mean_full = jnp.dot(mean, sel_t, preferred_element_type=jnp.float32)
    inv_full = jnp.dot(inv, sel_t, preferred_element_type=jnp.float32)
    o_ref[...] = (x * ((x - mean_full) * inv_full)).astype(o_ref.dtype)


# --------------------------- host-side tiling ------------------------------ #

def _cdiv(a, b):
    return -(-a // b)


def _round_down(v, m):
    return (v // m) * m


def _round_up(v, m):
    return _cdiv(v, m) * m


def _tpu_policy():
    """Per-generation tiling policy (robust fallback if detection fails)."""
    gen = 0
    try:
        kind = jax.devices()[0].device_kind.lower()
        for g in (7, 6, 5, 4):
            if ("v%d" % g) in kind or ("tpu%d" % g) in kind:
                gen = g
                break
    except Exception:
        gen = 0
    if gen >= 7:
        # v7x: 64 MiB VMEM, ~3.2 TB/s HBM, 2 TensorCores -> bigger blocks,
        # even multi-step grid for megacore.
        return dict(num_tc=2, target_block_bytes=6 << 20,
                    vmem_cap=44 << 20, min_block_bytes=1 << 20)
    if gen == 6:
        # v6e: 128 MiB VMEM, ~1.4 TB/s HBM, single TC -> one maximal block.
        return dict(num_tc=1, target_block_bytes=4 << 20,
                    vmem_cap=96 << 20, min_block_bytes=1 << 20)
    if gen == 5:
        # v5e: ~0.8 TB/s HBM -> 2 MiB blocks already sit at roofline, no split.
        return dict(num_tc=1, target_block_bytes=2 << 20,
                    vmem_cap=96 << 20, min_block_bytes=1 << 20)
    # Unknown generation: conservative numbers that fit every chip.
    return dict(num_tc=2, target_block_bytes=2 << 20,
                vmem_cap=44 << 20, min_block_bytes=1 << 20)


def _choose_tile_rows(rows, width, itemsize, policy):
    """Sublane-aligned row tile sized for ~target block bytes within VMEM."""
    sublane = {4: 8, 2: 16, 1: 32}.get(itemsize, 8)
    row_bytes = width * itemsize
    # Per-row VMEM footprint: double-buffered in + out blocks plus ~3 f32
    # full-row temporaries (upcast x and fused elementwise intermediates).
    per_row_vmem = 4 * row_bytes + 3 * width * 4
    budget_rows = max(1, (policy["vmem_cap"] - (2 << 20)) // per_row_vmem)

    if rows <= sublane:
        # TODO(synk): for giant H*W where even `sublane` rows overflow the VMEM
        # budget, tile H*W on a second "arbitrary" grid axis with a two-pass
        # (stats, then apply) scheme; not needed at these shapes.
        return rows

    by_target = max(1, policy["target_block_bytes"] // row_bytes)
    tile = min(by_target, budget_rows, rows)
    tile = max(sublane, _round_down(tile, sublane))
    tile = min(tile, _round_down(rows, sublane))

    # v7x megacore: prefer an even multi-step grid (both TensorCores busy and
    # output writeback overlapped), keeping every block >= min_block_bytes.
    if policy["num_tc"] >= 2 and rows * row_bytes >= 2 * policy["min_block_bytes"]:
        steps_now = _cdiv(rows, tile)
        if steps_now < 2 or steps_now % 2 == 1:
            for steps in (8, 6, 4, 2):
                if rows * row_bytes < steps * policy["min_block_bytes"]:
                    continue
                t = _round_up(_cdiv(rows, steps), sublane)
                if t > budget_rows or t >= rows:
                    continue
                if t * row_bytes < policy["min_block_bytes"]:
                    continue
                if _cdiv(rows, t) % 2 == 0:
                    tile = t
                    break
    return tile


def _pack_factor(rows, hw, max_k=32):
    """Planes packed per kernel row so the lane axis becomes 128-dense."""
    if hw % 128 == 0:
        return 1
    k = 128 // math.gcd(hw, 128)
    if 1 < k <= max_k and rows % k == 0:
        return k
    return 1


# ------------------------------ wrapper ------------------------------------ #

def simam(x, *, tile_rows=None):
    """x: (B, C, H, W) NCHW, float dtype.  Returns same shape/dtype."""
    b, c, h, w = x.shape
    rows, hw = b * c, h * w
    itemsize = x.dtype.itemsize
    policy = _tpu_policy()

    k = _pack_factor(rows, hw)
    prows, pwidth = rows // k, k * hw
    x2d = x.reshape(prows, pwidth)            # row-major: pure metadata reshape

    if tile_rows is None:
        tile_rows = _choose_tile_rows(prows, pwidth, itemsize, policy)
    grid = (_cdiv(prows, tile_rows),)

    block_bytes = tile_rows * pwidth * itemsize
    sel_bytes = 2 * pwidth * k * 4 if k > 1 else 0
    # Double-buffered in + out, f32 upcast temporaries, selectors, margin.
    vmem_limit = 4 * block_bytes + 3 * tile_rows * pwidth * 4 + 2 * sel_bytes + (2 << 20)
    vmem_limit = int(min(max(vmem_limit, 16 << 20), policy["vmem_cap"]))

    cost = pl.CostEstimate(
        flops=8 * rows * hw,
        transcendentals=0,
        bytes_accessed=2 * rows * hw * itemsize + sel_bytes,
    )
    compiler_params = pltpu.CompilerParams(
        dimension_semantics=("parallel",),
        vmem_limit_bytes=vmem_limit,
    )

    if k == 1:
        out2d = pl.pallas_call(
            partial(_simam_rowwise_kernel, hw=hw),
            out_shape=jax.ShapeDtypeStruct((prows, pwidth), x.dtype),
            grid_spec=pltpu.PrefetchScalarGridSpec(
                num_scalar_prefetch=0,
                grid=grid,
                in_specs=[pl.BlockSpec((tile_rows, pwidth), lambda i: (i, 0))],
                out_specs=pl.BlockSpec((tile_rows, pwidth), lambda i: (i, 0)),
            ),
            compiler_params=compiler_params,
            cost_estimate=cost,
        )(x2d)
    else:
        # 0/1 selector: column j marks lanes belonging to packed plane j.
        seg = jnp.arange(pwidth, dtype=jnp.int32) // hw
        sel = (seg[:, None] == jnp.arange(k, dtype=jnp.int32)[None, :]).astype(jnp.float32)
        sel_t = sel.T
        out2d = pl.pallas_call(
            partial(_simam_packed_kernel, hw=hw),
            out_shape=jax.ShapeDtypeStruct((prows, pwidth), x.dtype),
            grid_spec=pltpu.PrefetchScalarGridSpec(
                num_scalar_prefetch=0,
                grid=grid,
                in_specs=[
                    pl.BlockSpec((tile_rows, pwidth), lambda i: (i, 0)),
                    pl.BlockSpec((pwidth, k), lambda i: (0, 0)),
                    pl.BlockSpec((k, pwidth), lambda i: (0, 0)),
                ],
                out_specs=pl.BlockSpec((tile_rows, pwidth), lambda i: (i, 0)),
            ),
            compiler_params=compiler_params,
            cost_estimate=cost,
        )(x2d, sel, sel_t)

    return out2d.reshape(b, c, h, w)


# ------------------------------ reference ---------------------------------- #

def _simam_ref(x, e_lambda=E_LAMBDA):
    x_mean = jnp.mean(x, axis=(2, 3), keepdims=True)
    d = x - x_mean
    energy = jnp.sum(d * d, axis=(2, 3), keepdims=True)
    return x * (d / (energy + e_lambda))


if __name__ == "__main__":
    key = jax.random.PRNGKey(0)
    shapes = [
        (2, 4, 16, 16),   # main shape: H*W=256 lane-dense, single block
        (2, 64, 16, 16),  # more channels: larger slab, still one block
        (3, 5, 16, 16),   # rows not a multiple of the tile -> masked edge block
        (2, 8, 8, 8),     # H*W=64 -> packed path (2 planes/row, 128-dense lanes)
        (2, 4, 7, 7),     # ragged H*W=49 that cannot pack -> masked-store path
    ]
    for i, shp in enumerate(shapes):
        kk = jax.random.fold_in(key, i)
        x = jax.random.normal(kk, shp, dtype=jnp.float32)
        out = jax.block_until_ready(simam(x))
        ref = _simam_ref(x)
        assert out.shape == x.shape and out.dtype == x.dtype
        assert jnp.allclose(out, ref, atol=1e-5, rtol=1e-4), f"mismatch {shp}"
    print("KERNEL_OK")
</pallas_src>

<mosaic_0001>
module attributes {stable_mosaic.version = 11 : i64} {
  func.func @_simam_rowwise_kernel(%arg0: i32, %arg1: memref<8x256xf32, #tpu.memory_space<vmem>>, %arg2: memref<8x256xf32, #tpu.memory_space<vmem>>) attributes {dimension_semantics = [#tpu.dimension_semantics<parallel>], iteration_bounds = array<i64: 1>, scalar_prefetch = 0 : i64, scratch_operands = 0 : i64, tpu.core_type = #tpu.core_type<tc>, window_params = [{transform_indices = @transform_0, window_bounds = array<i64: 8, 256>}, {transform_indices = @transform_1, window_bounds = array<i64: 8, 256>}]} {
    %c0 = arith.constant 0 : index
    %c0_0 = arith.constant 0 : index
    %0 = vector.load %arg1[%c0, %c0_0] : memref<8x256xf32, #tpu.memory_space<vmem>>, vector<8x256xf32>
    %cst = arith.constant dense<0.000000e+00> : vector<8xf32>
    %1 = vector.multi_reduction <add>, %0, %cst [1] : vector<8x256xf32> to vector<8xf32>
    %2 = vector.shape_cast %1 : vector<8xf32> to vector<8x1xf32>
    %3 = arith.mulf %0, %0 : vector<8x256xf32>
    %cst_1 = arith.constant dense<0.000000e+00> : vector<8xf32>
    %4 = vector.multi_reduction <add>, %3, %cst_1 [1] : vector<8x256xf32> to vector<8xf32>
    %5 = vector.shape_cast %4 : vector<8xf32> to vector<8x1xf32>
    %cst_2 = arith.constant 3.906250e-03 : f32
    %6 = vector.broadcast %cst_2 : f32 to vector<8x1xf32>
    %7 = arith.mulf %2, %6 : vector<8x1xf32>
    %8 = arith.mulf %2, %7 : vector<8x1xf32>
    %9 = arith.subf %5, %8 : vector<8x1xf32>
    %cst_3 = arith.constant 0.000000e+00 : f32
    %10 = vector.broadcast %cst_3 : f32 to vector<8x1xf32>
    %11 = arith.maximumf %9, %10 : vector<8x1xf32>
    %cst_4 = arith.constant 9.99999974E-5 : f32
    %12 = vector.broadcast %cst_4 : f32 to vector<8x1xf32>
    %13 = arith.addf %11, %12 : vector<8x1xf32>
    %cst_5 = arith.constant 1.000000e+00 : f32
    %14 = vector.broadcast %cst_5 : f32 to vector<8x1xf32>
    %15 = arith.divf %14, %13 : vector<8x1xf32>
    %16 = vector.broadcast %7 : vector<8x1xf32> to vector<8x256xf32>
    %17 = arith.subf %0, %16 : vector<8x256xf32>
    %18 = vector.broadcast %15 : vector<8x1xf32> to vector<8x256xf32>
    %19 = arith.mulf %17, %18 : vector<8x256xf32>
    %20 = arith.mulf %0, %19 : vector<8x256xf32>
    %c0_6 = arith.constant 0 : index
    %c0_7 = arith.constant 0 : index
    %21 = vector.load %arg2[%c0_6, %c0_7] : memref<8x256xf32, #tpu.memory_space<vmem>>, vector<8x256xf32>
    tpu.vector_store %arg2[%c0_6, %c0_7], %20 {strides = array<i32>} : memref<8x256xf32, #tpu.memory_space<vmem>>, vector<8x256xf32>,
    return
  }
  func.func @transform_0(%arg0: i32) -> (i32, i32) {
    %c0_i32 = arith.constant 0 : i32
    %c0_i32_0 = arith.constant 0 : i32
    return %arg0, %c0_i32 : i32, i32
  }
  func.func @transform_1(%arg0: i32) -> (i32, i32) {
    %c0_i32 = arith.constant 0 : i32
    %c0_i32_0 = arith.constant 0 : i32
    return %arg0, %c0_i32 : i32, i32
  }
}

</mosaic_0001>

<bundles_post_ra>
// kernel: tpu_custom_call.1
= control target key start
LH: loop header
LB: loop body
LE: loop exit
PB: predicated region body
PF: predicated region fallthrough
CT: control target
= control target key end

     0   :  { %6 = vsyncpa [#allocation3], 0  ;;  %s149_s0 = inlined_call_operand.hbm [shape: f32[8,256], index: 0, kind: input, shape index: {}]   ;;  %s150_s1 = inlined_call_operand.hbm [shape: f32[8,256], index: 1, kind: output, shape index: {}]  }
   0x1   :  { %7 = vsyncpa [#allocation4], 0  ;;  %s113_s6 = smov [#allocation2]   ;;  %s65_s10 = scalar_lea.hbm %s149_s0, 256 }
   0x2   :  { %s14_s7 = sshll.u32 %s113_s6, 4  ;;  %p66_p0 = scmp.ne.s32.totalorder %s149_s0, %s65_s10  ;;  %s15_s7 = int_to_ptr.vmem [resolvable:$true] %s14_s7 }
   0x3   :  { %p69_p1 = scmp.lt.u32.totalorder %s65_s10, %s149_s0 }
   0x5   :  { %p71_p2 = pnand %p69_p1, %p66_p0 }
   0x7   :  { %74 = shalt.err (!%p71_p2)
}
   0x8   :  { %s75_s15 = scalar_lea.vmem %s15_s7, 256  ;;  %p80_p4 = scmp.lt.s32.totalorder %s15_s7, %s15_s7 }
   0x9   :  { %p76_p3 = scmp.ne.s32.totalorder %s15_s7, %s75_s15  ;;  %p81_p5 = scmp.lt.s32.totalorder %s75_s15, %s75_s15 }
   0xb   :  { %p82_p6 = por %p81_p5, %p80_p4 }
   0xd   :  { %p83_p7 = pnand %p82_p6, %p76_p3 }
   0xf   :  { %86 = shalt.err (!%p83_p7)
}
  0x10   :  { %17 = dma.hbm_to_vmem [thread:$0]  %s149_s0, 256, %s15_s7, [#allocation3]  }
  0x11   :  { %109 = dma.done.wait [#allocation3], 256  }
  0x12   :  { %110 = vsyncadd [#allocation3], 4294967040  ;;  %v21_v0 = vld [vmem:[#allocation2] sm:$0xff]  ;;  %v22_v1 = vld [vmem:[#allocation2 + $0x8] sm:$0xff]  ;;  %s114_s0 = smov [#allocation5]  }
  0x13   :  { %v23_v2 = vadd.f32 %v22_v1, %v21_v0  ;;  %v26_v3 = vmul.f32 %v21_v0, %v21_v0  ;;  %v27_v4 = vmul.f32 %v22_v1, %v22_v1  ;;  %s52_s18 = sshll.u32 %s114_s0, 4  ;;  %s53_s18 = int_to_ptr.vmem [resolvable:$true] %s52_s18 }
  0x14   :  { %s87_s19 = scalar_lea.vmem %s53_s18, 256  ;;  %p92_p9 = scmp.lt.s32.totalorder %s53_s18, %s53_s18 }
  0x15   :  { %24 = vadd.xlane.f32.xlu0 %v23_v2  ;;  %v28_v5 = vadd.f32 %v27_v4, %v26_v3  ;;  %p88_p8 = scmp.ne.s32.totalorder %s53_s18, %s87_s19  ;;  %p93_p10 = scmp.lt.s32.totalorder %s87_s19, %s87_s19 }
  0x17   :  { %p94_p11 = por %p93_p10, %p92_p9 }
  0x19   :  { %29 = vadd.xlane.f32.xlu0 %v28_v5  ;;  %p95_p12 = pnand %p94_p11, %p88_p8 }
  0xa2   :  { %v25_v6 = vpop.xlane.xlu0 %24 }
  0xa3   :  { %v31_v7 = vmul.f32 0.00390625, %v25_v6 }
  0xa5   :  { %v32_v8 = vmul.f32 %v31_v7, %v25_v6  ;;  %v38_v13 = vsub.f32 %v21_v0, %v31_v7  ;;  %v39_v14 = vsub.f32 %v22_v1, %v31_v7 }
  0xa6   :  { %v30_v9 = vpop.xlane.xlu0 %29 }
  0xa7   :  { %v33_v10 = vsub.f32 %v30_v9, %v32_v8 }
  0xa9   :  { %v34_v11 = vmax.f32 %v33_v10, 0.0 }
  0xab   :  { %v35_v12 = vadd.f32 0.0001, %v34_v11 }
  0xad   :  { %63 = vrcp.f32 %v35_v12 }
  0xb7   :  { %v64_v15 = vpop.eup %63 }
  0xb8   :  { %v40_v16 = vmul.f32 %v64_v15, %v38_v13  ;;  %v41_v17 = vmul.f32 %v64_v15, %v39_v14 }
  0xba   :  { %v42_v18 = vmul.f32 %v40_v16, %v21_v0  ;;  %v43_v19 = vmul.f32 %v41_v17, %v22_v1 }
  0xbc   :  { %44 = vst [vmem:[#allocation5] sm:$0xff] %v42_v18  ;;  %45 = vst [vmem:[#allocation5 + $0x8] sm:$0xff] %v43_v19 }
  0xbd   :  { %98 = shalt.err (!%p95_p12)
}
  0xbe   :  { %s99_s22 = scalar_lea.hbm %s150_s1, 256 }
  0xbf   :  { %p100_p13 = scmp.ne.s32.totalorder %s150_s1, %s99_s22  ;;  %p103_p0 = scmp.lt.u32.totalorder %s99_s22, %s150_s1 }
  0xc1   :  { %p105_p1 = pnand %p103_p0, %p100_p13 }
  0xc3   :  { %108 = shalt.err (!%p105_p1)
}
  0xc4   :  { %55 = dma.vmem_to_hbm [thread:$0]  %s53_s18, 256, %s150_s1, [#allocation4]  }
  0xc5   :  { %111 = dma.done.wait [#allocation4], 256  }
  0xc6   :  { %112 = vsyncadd [#allocation4], 4294967040 }
  0xc7   :  { %59 = vsyncpa [#allocation3], 1 }
  0xc8   :  { %60 = vsyncpa [#allocation4], 1 }

</bundles_post_ra>
